<compile_context>
chip_gen: v6e
topology: v6e:2x2x1
jax: 0.10.0
libtpu: 0.0.40
codegen_flags: <defaults>
</compile_context>

<pallas_src>
import functools

import jax
import jax.numpy as jnp
from jax import lax
from jax.experimental import pallas as pl
from jax.experimental.pallas import tpu as pltpu

_NEG_SLOPE = 0.2
_BN_EPS = 1e-5


def _conv1_leaky(x, w1_ref, b1_ref):
    """1x1 conv over tiny Cin as VPU broadcast-MACs, then LeakyReLU(0.2).

    x: (Cin, TP) f32 value; w1_ref: (ndf, Cin); b1_ref: (ndf, 1) -> (ndf, TP) f32.
    """
    w1 = w1_ref[...]
    cin = x.shape[0]
    acc = w1[:, 0:1] * x[0:1, :]
    for ci in range(1, cin):
        acc = acc + w1[:, ci:ci + 1] * x[ci:ci + 1, :]
    h = acc + b1_ref[...]
    return jnp.where(h > 0, h, _NEG_SLOPE * h)


def _stats_kernel(x_ref, w1_ref, b1_ref, w2_ref, sum_ref, ssq_ref, *, hw):
    """Pass 1: per-tile per-channel sum and sum-of-squares of conv2 output."""
    tp = x_ref.shape[2]
    x = x_ref[0]                                                  # (Cin, TP)
    h1 = _conv1_leaky(x, w1_ref, b1_ref)                          # (ndf, TP)
    h2 = jnp.dot(w2_ref[...], h1.astype(w2_ref.dtype),
                 preferred_element_type=jnp.float32)              # (ndf2, TP)
    if hw % tp != 0:
        # Mask out zero-padded pixels in the last spatial tile so batch stats
        # only see real pixels.
        t = pl.program_id(1)
        pix = t * tp + lax.broadcasted_iota(jnp.int32, (1, tp), 1)
        h2 = jnp.where(pix < hw, h2, 0.0)
    s = jnp.sum(h2, axis=1, keepdims=True)                        # (ndf2, 1)
    ss = jnp.sum(h2 * h2, axis=1, keepdims=True)
    sum_ref[...] = s.reshape(sum_ref.shape)
    ssq_ref[...] = ss.reshape(ssq_ref.shape)


def _apply_kernel(x_ref, w1_ref, b1_ref, w2_ref, scale_ref, shift_ref, w3_ref,
                  o_ref):
    """Pass 2: recompute conv1/conv2, apply BN (scale/shift), LeakyReLU, conv3."""
    x = x_ref[0]                                                  # (Cin, TP)
    h1 = _conv1_leaky(x, w1_ref, b1_ref)                          # (ndf, TP)
    h2 = jnp.dot(w2_ref[...], h1.astype(w2_ref.dtype),
                 preferred_element_type=jnp.float32)              # (ndf2, TP)
    h2 = h2 * scale_ref[...] + shift_ref[...]                     # BatchNorm
    h3 = jnp.where(h2 > 0, h2, _NEG_SLOPE * h2)                   # LeakyReLU
    # conv3 (ndf2 -> 1): column-weighted sublane reduction, lane-dense (1, TP).
    out = jnp.sum(h3 * w3_ref[...], axis=0, keepdims=True)
    o_ref[...] = out.reshape(o_ref.shape)


def discriminator_forward(x_nchw, params, matmul_dtype=jnp.float32):
    """x_nchw: (N, Cin, H, W) float32. Returns (N, 1, H, W) float32."""
    w1, b1, w2, w3, gamma, beta = params
    N, Cin, H, W = x_nchw.shape
    ndf = w1.shape[0]
    ndf2 = w2.shape[0]
    hw = H * W

    # Pixel tile: multiple of 128 lanes, ~512 for realistic sizes.
    lane = 128
    if hw >= 512:
        tp = 512
    else:
        tp = ((hw + lane - 1) // lane) * lane
    hw_pad = ((hw + tp - 1) // tp) * tp
    T = hw_pad // tp

    # (N, Cin, H, W) -> (N, Cin, HW): pure reshape, no transpose, no channel pad.
    x3 = x_nchw.reshape(N, Cin, hw).astype(jnp.float32)
    if hw_pad != hw:
        x3 = jnp.pad(x3, ((0, 0), (0, 0), (0, hw_pad - hw)))

    # Weights keep their native PyTorch (out, in) orientation.
    w1_m = w1.reshape(ndf, Cin).astype(jnp.float32)
    b1_m = b1.reshape(ndf, 1).astype(jnp.float32)
    w2_m = w2.reshape(ndf2, ndf).astype(matmul_dtype)   # bf16 fast path on v6e/v7x
    w3_m = w3.reshape(ndf2, 1).astype(jnp.float32)

    rep = lambda n, t: (0, 0)
    x_spec = pl.BlockSpec((1, Cin, tp), lambda n, t: (n, 0, t))
    w1_spec = pl.BlockSpec((ndf, Cin), rep)
    b1_spec = pl.BlockSpec((ndf, 1), rep)
    w2_spec = pl.BlockSpec((ndf2, ndf), rep)
    col_spec = pl.BlockSpec((ndf2, 1), rep)

    flops_c1 = 2 * N * hw_pad * Cin * ndf
    flops_c2 = 2 * N * hw_pad * ndf * ndf2
    flops_c3 = 2 * N * hw_pad * ndf2
    x_bytes = N * hw_pad * Cin * 4
    w_bytes = (ndf * Cin + ndf + ndf2 * ndf + ndf2) * 4
    cparams = pltpu.CompilerParams(dimension_semantics=("parallel", "parallel"))

    # ---- Pass 1: partial BatchNorm statistics -------------------------------
    psum, pssq = pl.pallas_call(
        functools.partial(_stats_kernel, hw=hw),
        grid=(N, T),
        in_specs=[x_spec, w1_spec, b1_spec, w2_spec],
        out_specs=[
            pl.BlockSpec((1, 1, ndf2, 1), lambda n, t: (n, t, 0, 0)),
            pl.BlockSpec((1, 1, ndf2, 1), lambda n, t: (n, t, 0, 0)),
        ],
        out_shape=[
            jax.ShapeDtypeStruct((N, T, ndf2, 1), jnp.float32),
            jax.ShapeDtypeStruct((N, T, ndf2, 1), jnp.float32),
        ],
        compiler_params=cparams,
        cost_estimate=pl.CostEstimate(
            flops=flops_c1 + flops_c2, transcendentals=0,
            bytes_accessed=x_bytes + w_bytes + 2 * N * T * ndf2 * 4),
    )(x3, w1_m, b1_m, w2_m)

    # Finalize batch stats (tiny) in XLA; fold BN into scale/shift.
    count = jnp.float32(N * hw)
    s = jnp.sum(psum, axis=(0, 1)).reshape(ndf2)
    ss = jnp.sum(pssq, axis=(0, 1)).reshape(ndf2)
    mean = s / count
    var = jnp.maximum(ss / count - mean * mean, 0.0)   # biased variance
    inv_std = lax.rsqrt(var + _BN_EPS)
    g = gamma.reshape(ndf2).astype(jnp.float32)
    b = beta.reshape(ndf2).astype(jnp.float32)
    scale = (g * inv_std).reshape(ndf2, 1)
    shift = (b - mean * g * inv_std).reshape(ndf2, 1)

    # ---- Pass 2: normalize + LeakyReLU + conv3 ------------------------------
    out = pl.pallas_call(
        _apply_kernel,
        grid=(N, T),
        in_specs=[x_spec, w1_spec, b1_spec, w2_spec, col_spec, col_spec, col_spec],
        out_specs=pl.BlockSpec((1, 1, tp), lambda n, t: (n, 0, t)),
        out_shape=jax.ShapeDtypeStruct((N, 1, hw_pad), jnp.float32),
        compiler_params=cparams,
        cost_estimate=pl.CostEstimate(
            flops=flops_c1 + flops_c2 + flops_c3, transcendentals=0,
            bytes_accessed=x_bytes + w_bytes + 2 * ndf2 * 4 + N * hw_pad * 4),
    )(x3, w1_m, b1_m, w2_m, scale, shift, w3_m)

    out = out[:, :, :hw].reshape(N, 1, H, W)
    return out


def init_params(key, input_nc, ndf=64):
    k1, k2, k3, kb = jax.random.split(key, 4)
    # Deterministic synthetic init (small scale); shapes match nn.Conv2d weights.
    w1 = jax.random.normal(k1, (ndf, input_nc, 1, 1), jnp.float32) * 0.1
    b1 = jax.random.normal(kb, (ndf,), jnp.float32) * 0.1
    w2 = jax.random.normal(k2, (ndf * 2, ndf, 1, 1), jnp.float32) * 0.1
    w3 = jax.random.normal(k3, (1, ndf * 2, 1, 1), jnp.float32) * 0.1
    gamma = jnp.ones((ndf * 2,), jnp.float32)   # BatchNorm2d default weight
    beta = jnp.zeros((ndf * 2,), jnp.float32)   # BatchNorm2d default bias
    return (w1, b1, w2, w3, gamma, beta)


def _reference_forward(x_nchw, params):
    """Plain-JAX reference of the same forward, for verification."""
    w1, b1, w2, w3, gamma, beta = params
    N, Cin, H, W = x_nchw.shape
    x = jnp.transpose(x_nchw, (0, 2, 3, 1)).reshape(-1, Cin)
    h = x @ w1.reshape(w1.shape[0], Cin).T + b1
    h = jnp.where(h > 0, h, 0.2 * h)
    h = h @ w2.reshape(w2.shape[0], w2.shape[1]).T
    mean = jnp.mean(h, axis=0, keepdims=True)
    var = jnp.mean((h - mean) ** 2, axis=0, keepdims=True)
    h = (h - mean) / jnp.sqrt(var + 1e-5) * gamma + beta
    h = jnp.where(h > 0, h, 0.2 * h)
    o = h @ w3.reshape(1, -1).T
    return jnp.transpose(o.reshape(N, H, W, 1), (0, 3, 1, 2))


if __name__ == "__main__":
    key = jax.random.PRNGKey(0)
    kx, kp = jax.random.split(key)

    N, Cin, H, W = 2, 4, 16, 16
    ndf = 64
    x = jax.random.normal(kx, (N, Cin, H, W), jnp.float32)
    params = init_params(kp, Cin, ndf)

    out = jax.block_until_ready(discriminator_forward(x, params))
    ref = jax.block_until_ready(_reference_forward(x, params))
    assert out.shape == (N, 1, H, W), out.shape
    assert jnp.allclose(out, ref, atol=1e-4, rtol=1e-4), "f32 mismatch vs reference"

    # bf16 MXU operands for the dominant conv2 matmul (v6e/v7x fast path).
    out_bf16 = jax.block_until_ready(
        discriminator_forward(x, params, matmul_dtype=jnp.bfloat16))
    assert jnp.allclose(out_bf16, ref, atol=5e-2, rtol=5e-2), "bf16 mismatch vs reference"

    print("KERNEL_OK")
</pallas_src>

<mosaic_0001>
module attributes {stable_mosaic.version = 11 : i64} {
  func.func @_stats_kernel(%arg0: i32, %arg1: i32, %arg2: memref<1x4x256xf32, #tpu.memory_space<vmem>>, %arg3: memref<64x4xf32, #tpu.memory_space<vmem>>, %arg4: memref<64x1xf32, #tpu.memory_space<vmem>>, %arg5: memref<128x64xf32, #tpu.memory_space<vmem>>, %arg6: memref<1x1x128x1xf32, #tpu.memory_space<vmem>>, %arg7: memref<1x1x128x1xf32, #tpu.memory_space<vmem>>) attributes {dimension_semantics = [#tpu.dimension_semantics<parallel>, #tpu.dimension_semantics<parallel>], iteration_bounds = array<i64: 2, 1>, scalar_prefetch = 0 : i64, scratch_operands = 0 : i64, tpu.core_type = #tpu.core_type<tc>, window_params = [{transform_indices = @transform_0, window_bounds = array<i64: 1, 4, 256>}, {pipeline_mode = #tpu.pipeline_mode<synchronous>, transform_indices = @transform_1, window_bounds = array<i64: 64, 4>}, {pipeline_mode = #tpu.pipeline_mode<synchronous>, transform_indices = @transform_2, window_bounds = array<i64: 64, 1>}, {pipeline_mode = #tpu.pipeline_mode<synchronous>, transform_indices = @transform_3, window_bounds = array<i64: 128, 64>}, {transform_indices = @transform_4, window_bounds = array<i64: 1, 1, 128, 1>}, {transform_indices = @transform_5, window_bounds = array<i64: 1, 1, 128, 1>}]} {
    %c0 = arith.constant 0 : index
    %c0_0 = arith.constant 0 : index
    %c0_1 = arith.constant 0 : index
    %0 = vector.load %arg2[%c0, %c0_0, %c0_1] : memref<1x4x256xf32, #tpu.memory_space<vmem>>, vector<1x4x256xf32>
    %1 = vector.shape_cast %0 : vector<1x4x256xf32> to vector<4x256xf32>
    %c0_2 = arith.constant 0 : index
    %c0_3 = arith.constant 0 : index
    %2 = vector.load %arg3[%c0_2, %c0_3] : memref<64x4xf32, #tpu.memory_space<vmem>>, vector<64x4xf32>
    %3 = vector.extract_strided_slice %2 {offsets = [0, 0], sizes = [64, 1], strides = [1, 1]} : vector<64x4xf32> to vector<64x1xf32>
    %4 = vector.extract_strided_slice %1 {offsets = [0, 0], sizes = [1, 256], strides = [1, 1]} : vector<4x256xf32> to vector<1x256xf32>
    %5 = vector.broadcast %3 : vector<64x1xf32> to vector<64x256xf32>
    %6 = vector.broadcast %4 : vector<1x256xf32> to vector<64x256xf32>
    %7 = arith.mulf %5, %6 : vector<64x256xf32>
    %8 = vector.extract_strided_slice %2 {offsets = [0, 1], sizes = [64, 1], strides = [1, 1]} : vector<64x4xf32> to vector<64x1xf32>
    %9 = vector.extract_strided_slice %1 {offsets = [1, 0], sizes = [1, 256], strides = [1, 1]} : vector<4x256xf32> to vector<1x256xf32>
    %10 = vector.broadcast %8 : vector<64x1xf32> to vector<64x256xf32>
    %11 = vector.broadcast %9 : vector<1x256xf32> to vector<64x256xf32>
    %12 = arith.mulf %10, %11 : vector<64x256xf32>
    %13 = arith.addf %7, %12 : vector<64x256xf32>
    %14 = vector.extract_strided_slice %2 {offsets = [0, 2], sizes = [64, 1], strides = [1, 1]} : vector<64x4xf32> to vector<64x1xf32>
    %15 = vector.extract_strided_slice %1 {offsets = [2, 0], sizes = [1, 256], strides = [1, 1]} : vector<4x256xf32> to vector<1x256xf32>
    %16 = vector.broadcast %14 : vector<64x1xf32> to vector<64x256xf32>
    %17 = vector.broadcast %15 : vector<1x256xf32> to vector<64x256xf32>
    %18 = arith.mulf %16, %17 : vector<64x256xf32>
    %19 = arith.addf %13, %18 : vector<64x256xf32>
    %20 = vector.extract_strided_slice %2 {offsets = [0, 3], sizes = [64, 1], strides = [1, 1]} : vector<64x4xf32> to vector<64x1xf32>
    %21 = vector.extract_strided_slice %1 {offsets = [3, 0], sizes = [1, 256], strides = [1, 1]} : vector<4x256xf32> to vector<1x256xf32>
    %22 = vector.broadcast %20 : vector<64x1xf32> to vector<64x256xf32>
    %23 = vector.broadcast %21 : vector<1x256xf32> to vector<64x256xf32>
    %24 = arith.mulf %22, %23 : vector<64x256xf32>
    %25 = arith.addf %19, %24 : vector<64x256xf32>
    %c0_4 = arith.constant 0 : index
    %c0_5 = arith.constant 0 : index
    %26 = vector.load %arg4[%c0_4, %c0_5] : memref<64x1xf32, #tpu.memory_space<vmem>>, vector<64x1xf32>
    %27 = vector.broadcast %26 : vector<64x1xf32> to vector<64x256xf32>
    %28 = arith.addf %25, %27 : vector<64x256xf32>
    %cst = arith.constant 0.000000e+00 : f32
    %29 = vector.broadcast %cst : f32 to vector<64x256xf32>
    %30 = arith.cmpf ogt, %28, %29 : vector<64x256xf32>
    %cst_6 = arith.constant 2.000000e-01 : f32
    %31 = vector.broadcast %cst_6 : f32 to vector<64x256xf32>
    %32 = arith.mulf %31, %28 : vector<64x256xf32>
    %33 = arith.select %30, %28, %32 : vector<64x256xi1>, vector<64x256xf32>
    %c0_7 = arith.constant 0 : index
    %c0_8 = arith.constant 0 : index
    %34 = vector.load %arg5[%c0_7, %c0_8] : memref<128x64xf32, #tpu.memory_space<vmem>>, vector<128x64xf32>
    %cst_9 = arith.constant dense<0.000000e+00> : vector<128x256xf32>
    %35 = tpu.matmul %34, %33, %cst_9 {dimension_numbers = #tpu.dot_dimension_numbers<[1], [0], [0], [1], [0, 0, 1, 1], [], []>} : vector<128x64xf32>, vector<64x256xf32>, vector<128x256xf32> -> vector<128x256xf32>
    %cst_10 = arith.constant dense<0.000000e+00> : vector<128xf32>
    %36 = vector.multi_reduction <add>, %35, %cst_10 [1] : vector<128x256xf32> to vector<128xf32>
    %37 = vector.shape_cast %36 : vector<128xf32> to vector<128x1xf32>
    %38 = arith.mulf %35, %35 : vector<128x256xf32>
    %cst_11 = arith.constant dense<0.000000e+00> : vector<128xf32>
    %39 = vector.multi_reduction <add>, %38, %cst_11 [1] : vector<128x256xf32> to vector<128xf32>
    %40 = vector.shape_cast %39 : vector<128xf32> to vector<128x1xf32>
    %41 = vector.shape_cast %37 : vector<128x1xf32> to vector<1x1x128x1xf32>
    %c0_12 = arith.constant 0 : index
    %c0_13 = arith.constant 0 : index
    %c0_14 = arith.constant 0 : index
    %c0_15 = arith.constant 0 : index
    %42 = vector.load %arg6[%c0_12, %c0_13, %c0_14, %c0_15] : memref<1x1x128x1xf32, #tpu.memory_space<vmem>>, vector<1x1x128x1xf32>
    tpu.vector_store %arg6[%c0_12, %c0_13, %c0_14, %c0_15], %41 {strides = array<i32>} : memref<1x1x128x1xf32, #tpu.memory_space<vmem>>, vector<1x1x128x1xf32>,
    %43 = vector.shape_cast %40 : vector<128x1xf32> to vector<1x1x128x1xf32>
    %c0_16 = arith.constant 0 : index
    %c0_17 = arith.constant 0 : index
    %c0_18 = arith.constant 0 : index
    %c0_19 = arith.constant 0 : index
    %44 = vector.load %arg7[%c0_16, %c0_17, %c0_18, %c0_19] : memref<1x1x128x1xf32, #tpu.memory_space<vmem>>, vector<1x1x128x1xf32>
    tpu.vector_store %arg7[%c0_16, %c0_17, %c0_18, %c0_19], %43 {strides = array<i32>} : memref<1x1x128x1xf32, #tpu.memory_space<vmem>>, vector<1x1x128x1xf32>,
    return
  }
  func.func @transform_0(%arg0: i32, %arg1: i32) -> (i32, i32, i32) {
    %c0_i32 = arith.constant 0 : i32
    %c0_i32_0 = arith.constant 0 : i32
    return %arg0, %c0_i32, %arg1 : i32, i32, i32
  }
  func.func @transform_1(%arg0: i32, %arg1: i32) -> (i32, i32) {
    %c0_i32 = arith.constant 0 : i32
    %c0_i32_0 = arith.constant 0 : i32
    %c0_i32_1 = arith.constant 0 : i32
    return %c0_i32, %c0_i32_0 : i32, i32
  }
  func.func @transform_2(%arg0: i32, %arg1: i32) -> (i32, i32) {
    %c0_i32 = arith.constant 0 : i32
    %c0_i32_0 = arith.constant 0 : i32
    %c0_i32_1 = arith.constant 0 : i32
    return %c0_i32, %c0_i32_0 : i32, i32
  }
  func.func @transform_3(%arg0: i32, %arg1: i32) -> (i32, i32) {
    %c0_i32 = arith.constant 0 : i32
    %c0_i32_0 = arith.constant 0 : i32
    %c0_i32_1 = arith.constant 0 : i32
    return %c0_i32, %c0_i32_0 : i32, i32
  }
  func.func @transform_4(%arg0: i32, %arg1: i32) -> (i32, i32, i32, i32) {
    %c0_i32 = arith.constant 0 : i32
    %c0_i32_0 = arith.constant 0 : i32
    %c0_i32_1 = arith.constant 0 : i32
    return %arg0, %arg1, %c0_i32, %c0_i32_0 : i32, i32, i32, i32
  }
  func.func @transform_5(%arg0: i32, %arg1: i32) -> (i32, i32, i32, i32) {
    %c0_i32 = arith.constant 0 : i32
    %c0_i32_0 = arith.constant 0 : i32
    %c0_i32_1 = arith.constant 0 : i32
    return %arg0, %arg1, %c0_i32, %c0_i32_0 : i32, i32, i32, i32
  }
}

</mosaic_0001>

<bundles_post_ra>
// kernel: tpu_custom_call.1
= control target key start
LH: loop header
LB: loop body
LE: loop exit
PB: predicated region body
PF: predicated region fallthrough
CT: control target
= control target key end

     0   :  { %s1420_s18 = smov 0   ;;  %s1422_s19 = smov 0   ;;  %s1827_s0 = inlined_call_operand.vmem [shape: f32[2,4,256], index: 0, kind: input, shape index: {}]   ;;  %s1828_s1 = inlined_call_operand.vmem [shape: f32[64,4], index: 1, kind: input, shape index: {}]   ;;  %s1829_s2 = inlined_call_operand.vmem [shape: f32[64,1], index: 2, kind: input, shape index: {}]   ;;  %s1830_s3 = inlined_call_operand.vmem [shape: f32[128,64], index: 3, kind: input, shape index: {}]   ;;  %s1831_s4 = inlined_call_operand.vmem [shape: f32[2,1,128,1], index: 4, kind: output, shape index: {0}]   ;;  %s1832_s5 = inlined_call_operand.vmem [shape: f32[2,1,128,1], index: 5, kind: output, shape index: {1}]  }
   0x1   :  { %s1424_s20 = smov 0  }
   0x2 LB: > { %s28_s21 = sadd.s32 1, %s1379_s19  ;;  %p1261_p0 = scmp.ge.s32.totalorder %s1383_s20, 1  ;;  %s1383_s20 = sphi %s1424_s20, %s16_s20   ;;  %s1379_s19 = sphi %s1422_s19, %s1834_s19   ;;  %s1375_s18 = sphi %s1420_s18, %s1833_s18  }
   0x3   : > { %p30_p1 = scmp.ge.s32.totalorder %s28_s21, 2  ;;  %p213_p2 = scmp.lt.s32.totalorder %s1383_s20, 3 }
   0x5   : > { %s1836_s21 = smov (%p30_p1, %s28_s21), 0  ;;  %p214_p3 = pnand %p1261_p0, %p213_p2 }
   0x6   : > { %p259_p4 = scmp.lt.s32.totalorder (!%p214_p3), %s1375_s18, 1 }
   0x7   : > { %217 = sbr.rel (%p214_p3) target bundleno = 661 (0x295), region = 36 }
   0xc   : > { %v293_v0 = vld [vmem:[%s1828_s1 + $0x30] sm:$0xff]  ;;  %v292_v1 = vld [vmem:[%s1828_s1 + $0x28] sm:$0xff]  ;;  %v1385_v2 = vmov 2   ;;  %v1386_v3 = vmov 0   ;;  %v290_v4 = vld [vmem:[%s1828_s1 + $0x18] sm:$0xff]  ;;  %v1387_v5 = vmov 1   ;;  %v336_v28 = vlaneseq }
   0xd   : > { %1341 = vset.pattern.permute.xlu0 %v1385_v2  ;;  %1334 = vset.pattern.permute.xlu1 %v1386_v3  ;;  %v294_v6 = vld [vmem:[%s1828_s1 + $0x38] sm:$0xff]  ;;  %v1388_v7 = vmov 3   ;;  %v291_v8 = vld [vmem:[%s1828_s1 + $0x20] sm:$0xff]  ;;  %v288_v11 = vld [vmem:[%s1828_s1 + $0x8] sm:$0xff]  ;;  %v1389_v22 = vmov 0.0   ;;  %s1838_s18 = smov (!%p259_p4, %s1375_s18), 1 }
   0xe   : > { %327 = vperm.xlu1 %1334, %v293_v0   ;;  %473 = vperm.xlu0 %1341, %v292_v1   ;;  %v287_v9 = vld [vmem:[%s1828_s1] sm:$0xff]  ;;  %v623_v10 = vld [vmem:[%s1829_s2 + $0x38] sm:$0xff]  ;;  %v289_v14 = vld [vmem:[%s1828_s1 + $0x10] sm:$0xff]  ;;  %s1286_s8 = sshll.u32 %s1838_s18, 3  ;;  %v337_v30 = vshrl.u32 %v336_v28, 7  ;;  %s1287_s27 = sshll.u32 %s1838_s18, 7 }
   0xf   : > { %v620_v12 = vld [vmem:[%s1829_s2 + $0x20] sm:$0xff]  ;;  %v619_v13 = vld [vmem:[%s1829_s2 + $0x18] sm:$0xff]  ;;  %v618_v15 = vld [vmem:[%s1829_s2 + $0x10] sm:$0xff]  ;;  %857 = vmatprep.mubr.f32.mxu0 %v1389_v22  ;;  %905 = vmatprep.mubr.f32.mxu1 %v1389_v22  ;;  %s266_s11 = scalar_lea.vmem %s1827_s0, %s1286_s8  ;;  %s1747_s30 = scalar_lea.vmem %s1831_s4, %s1287_s27 }
  0x10   : > { %v616_v16 = vld [vmem:[%s1829_s2] sm:$0xff]  ;;  %v622_v17 = vld [vmem:[%s1829_s2 + $0x30] sm:$0xff]  ;;  %v621_v18 = vld [vmem:[%s1829_s2 + $0x28] sm:$0xff]  ;;  %v404_v32 = vsub.s32 1, %v337_v30  ;;  %v408_v33 = vsub.s32 5, %v337_v30  ;;  %v338_v35 = vsub.s32 0, %v337_v30  ;;  %s1756_s18 = scalar_lea.vmem %s1832_s5, %s1287_s27 }
  0x11   : > { %v617_v19 = vld [vmem:[%s1829_s2 + $0x8] sm:$0xff]  ;;  %v342_v36 = vsub.s32 4, %v337_v30  ;;  %v286_v38 = vld [vmem:[%s266_s11] sm:$0xff]  ;;  %v486_v39 = vsub.s32 2, %v337_v30  ;;  %v490_v40 = vsub.s32 6, %v337_v30  ;;  %v568_v41 = vsub.s32 3, %v337_v30 }
  0x12   : > { %1335 = vset.pattern.permute.xlu1 %v1387_v5  ;;  %465 = vperm.xlu0 %1341, %v290_v4   ;;  %v572_v42 = vsub.s32 7, %v337_v30  ;;  %v405_v43 = vrot.slane %v286_v38, %v404_v32  ;;  %v409_v44 = vrot.slane %v286_v38, %v408_v33  ;;  %v339_v46 = vrot.slane %v286_v38, %v338_v35 }
  0x13   : > { %395 = vperm.xlu1 %1335, %v293_v0   ;;  %v343_v47 = vrot.slane %v286_v38, %v342_v36  ;;  %v487_v49 = vrot.slane %v286_v38, %v486_v39  ;;  %v491_v50 = vrot.slane %v286_v38, %v490_v40  ;;  %v569_v51 = vrot.slane %v286_v38, %v568_v41 }
  0x14   : > { %v573_v52 = vrot.slane %v286_v38, %v572_v42  ;;  %v1537_v53 = vrot.slane %v405_v43, %v404_v32  ;;  %v1539_v54 = vrot.slane %v409_v44, %v404_v32  ;;  %v1541_v55 = vrot.slane %v339_v46, %v338_v35 }
  0x15   : > { %v1543_v56 = vrot.slane %v343_v47, %v338_v35  ;;  %v1549_v60 = vrot.slane %v487_v49, %v486_v39  ;;  %v1551_v61 = vrot.slane %v491_v50, %v486_v39  ;;  %v1553_v62 = vrot.slane %v569_v51, %v568_v41 }
  0x16   : > { %1348 = vset.pattern.permute.xlu0 %v1388_v7  ;;  %v1555_v63 = vrot.slane %v573_v52, %v568_v41 }
  0x17   : > { %1336 = vset.pattern.permute.xlu1 %v1385_v2  ;;  %563 = vperm.xlu0 %1348, %v294_v6  }
  0x18   : > { %481 = vperm.xlu1 %1336, %v294_v6  }
  0x1b   : > { %547 = vperm.xlu0 %1348, %v290_v4  }
  0x1c   : > { %1337 = vset.pattern.permute.xlu1 %v1387_v5 }
  0x1d   : > { %391 = vperm.xlu1 %1337, %v292_v1  }
  0x1f   : > { %1353 = vset.pattern.permute.xlu0 %v1387_v5 }
  0x20   : > { %399 = vperm.xlu0 %1353, %v294_v6  }
  0x21   : > { %1338 = vset.pattern.permute.xlu1 %v1385_v2 }
  0x22   : > { %477 = vperm.xlu1 %1338, %v293_v0  }
  0x24   : > { %383 = vperm.xlu0 %1353, %v290_v4  }
  0x26   : > { %1339 = vset.pattern.permute.xlu1 %v1386_v3 }
  0x27   : > { %317 = vperm.xlu1 %1339, %v291_v8  }
  0x28   : > { %371 = vperm.xlu0 %1353, %v287_v9  }
  0x2b   : > { %1340 = vset.pattern.permute.xlu1 %v1387_v5 }
  0x2c   : > { %387 = vperm.xlu1 %1340, %v291_v8   ;;  %1355 = vset.pattern.permute.xlu0 %v1386_v3 }
  0x2d   : > { %332 = vperm.xlu0 %1355, %v294_v6  }
  0x30   : > { %1342 = vset.pattern.permute.xlu1 %v1388_v7 }
  0x31   : > { %559 = vperm.xlu1 %1342, %v293_v0   ;;  %322 = vperm.xlu0 %1355, %v292_v1  }
  0x35   : > { %1343 = vset.pattern.permute.xlu1 %v1386_v3  ;;  %661 = vperm.xlu0 %1355, %v623_v10  }
  0x36   : > { %312 = vperm.xlu1 %1343, %v290_v4  }
  0x39   : > { %302 = vperm.xlu0 %1355, %v288_v11  }
  0x3a   : > { %1344 = vset.pattern.permute.xlu1 %v1385_v2 }
  0x3b   : > { %469 = vperm.xlu1 %1344, %v291_v8  }
  0x3d   : > { %646 = vperm.xlu0 %1355, %v620_v12  }
  0x3f   : > { %1345 = vset.pattern.permute.xlu1 %v1388_v7 }
  0x40   : > { %555 = vperm.xlu1 %1345, %v292_v1  }
  0x41   : > { %641 = vperm.xlu0 %1355, %v619_v13  }
  0x44   : > { %1346 = vset.pattern.permute.xlu1 %v1386_v3 }
  0x45   : > { %307 = vperm.xlu1 %1346, %v289_v14   ;;  %636 = vperm.xlu0 %1355, %v618_v15  }
  0x49   : > { %1347 = vset.pattern.permute.xlu1 %v1387_v5  ;;  %626 = vperm.xlu0 %1355, %v616_v16  }
  0x4a   : > { %379 = vperm.xlu1 %1347, %v289_v14  }
  0x4e   : > { %1349 = vset.pattern.permute.xlu1 %v1388_v7 }
  0x4f   : > { %551 = vperm.xlu1 %1349, %v291_v8  }
  0x53   : > { %1350 = vset.pattern.permute.xlu1 %v1386_v3 }
  0x54   : > { %656 = vperm.xlu1 %1350, %v622_v17  }
  0x58   : > { %1351 = vset.pattern.permute.xlu1 %v1387_v5 }
  0x59   : > { %375 = vperm.xlu1 %1351, %v288_v11  }
  0x5d   : > { %1352 = vset.pattern.permute.xlu1 %v1385_v2 }
  0x5e   : > { %461 = vperm.xlu1 %1352, %v289_v14  }
  0x62   : > { %1354 = vset.pattern.permute.xlu1 %v1386_v3 }
  0x63   : > { %651 = vperm.xlu1 %1354, %v621_v18  }
  0x67   : > { %297 = vperm.xlu1 %1354, %v287_v9  }
  0x6b   : > { %1356 = vset.pattern.permute.xlu1 %v1385_v2 }
  0x6c   : > { %457 = vperm.xlu1 %1356, %v288_v11  }
  0x70   : > { %1357 = vset.pattern.permute.xlu1 %v1388_v7 }
  0x71   : > { %543 = vperm.xlu1 %1357, %v289_v14  }
  0x75   : > { %1358 = vset.pattern.permute.xlu1 %v1385_v2 }
  0x76   : > { %453 = vperm.xlu1 %1358, %v287_v9  }
  0x7a   : > { %1359 = vset.pattern.permute.xlu1 %v1388_v7 }
  0x7b   : > { %539 = vperm.xlu1 %1359, %v288_v11  }
  0x7f   : > { %535 = vperm.xlu1 %1359, %v287_v9  }
  0x83   : > { %1360 = vset.pattern.permute.xlu1 %v1386_v3 }
  0x84   : > { %631 = vperm.xlu1 %1360, %v617_v19  }
  0x89   : > { %v1509_v20 = vpop.permute.xlu1 %327  ;;  %v1511_v21 = vpop.permute.xlu0 %473 }
  0x8a   : > { %v366_v51 = vmul.f32 %v1541_v55, %v1509_v20  ;;  %v367_v52 = vmul.f32 %v1543_v56, %v1509_v20 }
  0x8d   : > { %v1515_v23 = vpop.permute.xlu0 %465 }
  0x8e   : > { %v1517_v24 = vpop.permute.xlu1 %395  ;;  %v508_v18 = vmul.f32 %v1549_v60, %v1515_v23  ;;  %v509_v19 = vmul.f32 %v1551_v61, %v1515_v23 }
  0x8f   : > { %v432_v49 = vmul.f32 %v1537_v53, %v1517_v24  ;;  %v433_v50 = vmul.f32 %v1539_v54, %v1517_v24 }
  0x92   : > { %v564_v25 = vpop.permute.xlu0 %563 }
  0x93   : > { %v482_v26 = vpop.permute.xlu1 %481  ;;  %v598_v7 = vmul.f32 %v1553_v62, %v564_v25  ;;  %v599_v8 = vmul.f32 %v1555_v63, %v564_v25 }
  0x94   : > { %v516_v5 = vmul.f32 %v1549_v60, %v482_v26  ;;  %v517_v6 = vmul.f32 %v1551_v61, %v482_v26 }
  0x96   : > { %v1523_v27 = vpop.permute.xlu0 %547 }
  0x97   : > { %v590_v32 = vmul.f32 %v1553_v62, %v1523_v27  ;;  %v591_v33 = vmul.f32 %v1555_v63, %v1523_v27 }
  0x98   : > { %v1525_v29 = vpop.permute.xlu1 %391 }
  0x9b   : > { %v400_v31 = vpop.permute.xlu0 %399 }
  0x9c   : > { %v434_v57 = vmul.f32 %v1537_v53, %v400_v31  ;;  %v435_v58 = vmul.f32 %v1539_v54, %v400_v31 }
  0x9d   : > { %v1531_v34 = vpop.permute.xlu1 %477 }
  0x9f   : > { %v384_v37 = vpop.permute.xlu0 %383 }
  0xa0   : > { %v426_v13 = vmul.f32 %v1537_v53, %v384_v37  ;;  %v427_v14 = vmul.f32 %v1539_v54, %v384_v37 }
  0xa2   : > { %v1533_v45 = vpop.permute.xlu1 %317 }
  0xa3   : > { %v1535_v48 = vpop.permute.xlu0 %371 }
  0xa7   : > { %v1547_v59 = vpop.permute.xlu1 %387 }
  0xa8   : > { %v333_v0 = vpop.permute.xlu0 %332  ;;  %v429_v20 = vmul.f32 %v1539_v54, %v1547_v59 }
  0xa9   : > { %v368_v1 = vmul.f32 %v1541_v55, %v333_v0  ;;  %v369_v2 = vmul.f32 %v1543_v56, %v333_v0  ;;  %v448_v0 = vadd.f32 %v432_v49, %v366_v51 }
  0xab   : > { %v450_v3 = vadd.f32 %v434_v57, %v368_v1  ;;  %v451_v4 = vadd.f32 %v435_v58, %v369_v2  ;;  %v514_v57 = vmul.f32 %v1549_v60, %v1531_v34  ;;  %v515_v58 = vmul.f32 %v1551_v61, %v1531_v34 }
  0xac   : > { %v560_v9 = vpop.permute.xlu1 %559  ;;  %v1563_v10 = vpop.permute.xlu0 %322  ;;  %v449_v1 = vadd.f32 %v433_v50, %v367_v52  ;;  %v363_v34 = vmul.f32 %v1543_v56, %v1533_v45 }
  0xad   : > { %v532_v11 = vadd.f32 %v516_v5, %v450_v3  ;;  %v533_v12 = vadd.f32 %v517_v6, %v451_v4  ;;  %v596_v2 = vmul.f32 %v1553_v62, %v560_v9  ;;  %v597_v3 = vmul.f32 %v1555_v63, %v560_v9 }
  0xae   : > { %v530_v24 = vadd.f32 %v514_v57, %v448_v0  ;;  %v531_v5 = vadd.f32 %v515_v58, %v449_v1 }
  0xaf   : > { %v614_v16 = vadd.f32 %v598_v7, %v532_v11  ;;  %v615_v17 = vadd.f32 %v599_v8, %v533_v12 }
  0xb0   : > { %v662_v15 = vpop.permute.xlu0 %661  ;;  %v612_v6 = vadd.f32 %v596_v2, %v530_v24  ;;  %v613_v7 = vadd.f32 %v597_v3, %v531_v5 }
  0xb1   : > { %v313_v26 = vpop.permute.xlu1 %312  ;;  %v678_v25 = vadd.f32 %v662_v15, %v614_v16  ;;  %v679_v28 = vadd.f32 %v662_v15, %v615_v17  ;;  %v362_v17 = vmul.f32 %v1541_v55, %v1533_v45  ;;  %v431_v45 = vmul.f32 %v1539_v54, %v1525_v29 }
  0xb2   : > { %v360_v30 = vmul.f32 %v1541_v55, %v313_v26  ;;  %v361_v31 = vmul.f32 %v1543_v56, %v313_v26  ;;  %v365_v26 = vmul.f32 %v1543_v56, %v1563_v10 }
  0xb3   : > { %vm695_vm0 = vcmp.gt.f32.partialorder %v679_v28, 0.0  ;;  %v711_v37 = vmul.f32 0.2, %v679_v28  ;;  %vm694_vm1 = vcmp.gt.f32.partialorder %v678_v25, 0.0  ;;  %v710_v38 = vmul.f32 0.2, %v678_v25 }
  0xb4   : > { %v442_v35 = vadd.f32 %v426_v13, %v360_v30  ;;  %v443_v36 = vadd.f32 %v427_v14, %v361_v31  ;;  %v1601_v11 = vpop.permute.xlu0 %302  ;;  %v428_v14 = vmul.f32 %v1537_v53, %v1547_v59 }
  0xb5   : > { %v727_v39 = vsel %vm695_vm0, %v679_v28, %v711_v37  ;;  %v726_v42 = vsel %vm694_vm1, %v678_v25, %v710_v38  ;;  %v512_v37 = vmul.f32 %v1549_v60, %v1511_v21  ;;  %v513_v38 = vmul.f32 %v1551_v61, %v1511_v21 }
  0xb6   : > { %v470_v23 = vpop.permute.xlu1 %469  ;;  %v524_v40 = vadd.f32 %v508_v18, %v442_v35  ;;  %v525_v41 = vadd.f32 %v509_v19, %v443_v36  ;;  %809 = vmatprep.subr.mxu0 %v727_v39  ;;  %1289 = vmatprep.subr.mxu1 %v727_v39  ;;  %v445_v18 = vadd.f32 %v429_v20, %v363_v34  ;;  %vm744_vm0 = vcmask 523264  }
  0xb7   : > { %810 = vmatpush1.msra.mxu0 %v726_v42  ;;  %1297 = vmatpush1.msra.mxu1 %v726_v42  ;;  %v511_v9 = vmul.f32 %v1551_v61, %v470_v23  ;;  %v364_v19 = vmul.f32 %v1541_v55, %v1563_v10  ;;  %v510_v25 = vmul.f32 %v1549_v60, %v470_v23  ;;  %vm1082_vm1 = vcmask 7168  }
  0xb8   : > { %v1577_v43 = vadd.f32 %v590_v32, %v524_v40  ;;  %v1579_v44 = vadd.f32 %v591_v33, %v525_v41  ;;  %v430_v32 = vmul.f32 %v1537_v53, %v1525_v29  ;;  %v444_v33 = vadd.f32 %v428_v14, %v362_v17  ;;  %v647_v36 = vpop.permute.xlu0 %646 }
  0xb9   : > { %v527_v35 = vadd.f32 %v511_v9, %v445_v18  ;;  %v447_v39 = vadd.f32 %v431_v45, %v365_v26 }
  0xba   : > { %v446_v23 = vadd.f32 %v430_v32, %v364_v19  ;;  %v526_v40 = vadd.f32 %v510_v25, %v444_v33 }
  0xbb   : > { %v556_v27 = vpop.permute.xlu1 %555  ;;  %v529_v52 = vadd.f32 %v513_v38, %v447_v39 }
  0xbc   : > { %v594_v29 = vmul.f32 %v1553_v62, %v556_v27  ;;  %v595_v42 = vmul.f32 %v1555_v63, %v556_v27  ;;  %v528_v51 = vadd.f32 %v512_v37, %v446_v23  ;;  %v642_v57 = vpop.permute.xlu0 %641 }
  0xbd   : > { %v671_v21 = vadd.f32 %v642_v57, %v1579_v44  ;;  %v670_v5 = vadd.f32 %v642_v57, %v1577_v43 }
  0xbe   : > { %v610_v0 = vadd.f32 %v594_v29, %v528_v51  ;;  %v611_v1 = vadd.f32 %v595_v42, %v529_v52  ;;  %v356_v29 = vmul.f32 %v1541_v55, %v1601_v11  ;;  %v357_v52 = vmul.f32 %v1543_v56, %v1601_v11 }
  0xbf   : > { %v703_v34 = vmul.f32 0.2, %v671_v21  ;;  %vm687_vm8 = vcmp.gt.f32.partialorder %v671_v21, 0.0  ;;  %v702_v44 = vmul.f32 0.2, %v670_v5  ;;  %vm686_vm9 = vcmp.gt.f32.partialorder %v670_v5, 0.0 }
  0xc0   : > { %v1581_v46 = vpop.permute.xlu1 %307  ;;  %v637_v37 = vpop.permute.xlu0 %636 }
  0xc1   : > { %v719_v17 = vsel %vm687_vm8, %v671_v21, %v703_v34  ;;  %v358_v18 = vmul.f32 %v1541_v55, %v1581_v46  ;;  %v718_v19 = vsel %vm686_vm9, %v670_v5, %v702_v44  ;;  %v359_v26 = vmul.f32 %v1543_v56, %v1581_v46 }
  0xc5   : > { %v1583_v47 = vpop.permute.xlu1 %379 }
  0xc6   : > { %v424_v9 = vmul.f32 %v1537_v53, %v1583_v47 }
  0xca   : > { %v552_v4 = vpop.permute.xlu1 %551 }
  0xcb   : > { %v593_v59 = vmul.f32 %v1555_v63, %v552_v4  ;;  %v592_v10 = vmul.f32 %v1553_v62, %v552_v4 }
  0xcd   : > { %v609_v41 = vadd.f32 %v593_v59, %v527_v35  ;;  %v608_v50 = vadd.f32 %v592_v10, %v526_v40 }
  0xcf   : > { %v657_v8 = vpop.permute.xlu1 %656  ;;  %v673_v58 = vadd.f32 %v647_v36, %v609_v41  ;;  %v672_v2 = vadd.f32 %v647_v36, %v608_v50  ;;  %v420_v41 = vmul.f32 %v1537_v53, %v1535_v48 }
  0xd0   : > { %v676_v12 = vadd.f32 %v657_v8, %v612_v6  ;;  %v677_v13 = vadd.f32 %v657_v8, %v613_v7 }
  0xd1   : > { %v705_v6 = vmul.f32 0.2, %v673_v58  ;;  %vm689_vm6 = vcmp.gt.f32.partialorder %v673_v58, 0.0  ;;  %v704_v8 = vmul.f32 0.2, %v672_v2  ;;  %vm688_vm7 = vcmp.gt.f32.partialorder %v672_v2, 0.0 }
  0xd2   : > { %vm693_vm2 = vcmp.gt.f32.partialorder %v677_v13, 0.0  ;;  %v709_v15 = vmul.f32 0.2, %v677_v13  ;;  %vm692_vm3 = vcmp.gt.f32.partialorder %v676_v12, 0.0  ;;  %v708_v16 = vmul.f32 0.2, %v676_v12 }
  0xd3   : > { %v721_v14 = vsel %vm689_vm6, %v673_v58, %v705_v6  ;;  %v720_v43 = vsel %vm688_vm7, %v672_v2, %v704_v8 }
  0xd4   : > { %v1616_v28 = vpop.permute.xlu1 %375  ;;  %v725_v30 = vsel %vm693_vm2, %v677_v13, %v709_v15  ;;  %v724_v31 = vsel %vm692_vm3, %v676_v12, %v708_v16  ;;  %v425_v15 = vmul.f32 %v1539_v54, %v1583_v47  ;;  %v440_v47 = vadd.f32 %v424_v9, %v358_v18 }
  0xd5   : > { %811 = vmatprep.subr.mxu0 %v725_v30  ;;  %1290 = vmatprep.subr.mxu1 %v725_v30  ;;  %v422_v57 = vmul.f32 %v1537_v53, %v1616_v28  ;;  %v423_v58 = vmul.f32 %v1539_v54, %v1616_v28 }
  0xd6   : > { %812 = vmatpush1.msra.mxu0 %v724_v31  ;;  %1298 = vmatpush1.msra.mxu1 %v724_v31  ;;  %v441_v30 = vadd.f32 %v425_v15, %v359_v26  ;;  %v728_v26 = vld [vmem:[%s1830_s3] sm:$0xff] }
  0xd7   : > { %v438_v21 = vadd.f32 %v422_v57, %v356_v29  ;;  %v439_v28 = vadd.f32 %v423_v58, %v357_v52 }
  0xd9   : > { %v462_v49 = vpop.permute.xlu1 %461 }
  0xda   : > { %v506_v25 = vmul.f32 %v1549_v60, %v462_v49  ;;  %v507_v59 = vmul.f32 %v1551_v61, %v462_v49 }
  0xdc   : > { %v522_v32 = vadd.f32 %v506_v25, %v440_v47  ;;  %v523_v45 = vadd.f32 %v507_v59, %v441_v30  ;;  %v736_v25 = vld [vmem:[%s1830_s3 + $0x40] sm:$0xff]  ;;  %v729_v47 = vld [vmem:[%s1830_s3 + $0x8] sm:$0xff] }
  0xdd   : > { %v737_v30 = vld [vmem:[%s1830_s3 + $0x48] sm:$0xff] }
  0xde   : > { %v652_v3 = vpop.permute.xlu1 %651 }
  0xdf   : > { %v674_v4 = vadd.f32 %v652_v3, %v610_v0  ;;  %v675_v24 = vadd.f32 %v652_v3, %v611_v1  ;;  %v421_v1 = vmul.f32 %v1539_v54, %v1535_v48 }
  0xe1   : > { %vm691_vm4 = vcmp.gt.f32.partialorder %v675_v24, 0.0  ;;  %v707_v7 = vmul.f32 0.2, %v675_v24  ;;  %vm690_vm5 = vcmp.gt.f32.partialorder %v674_v4, 0.0  ;;  %v706_v27 = vmul.f32 0.2, %v674_v4 }
  0xe2   : > { %v298_v20 = vpop.permute.xlu1 %297 }
  0xe3   : > { %v723_v12 = vsel %vm691_vm4, %v675_v24, %v707_v7  ;;  %v722_v13 = vsel %vm690_vm5, %v674_v4, %v706_v27  ;;  %v354_v42 = vmul.f32 %v1541_v55, %v298_v20  ;;  %v355_v49 = vmul.f32 %v1543_v56, %v298_v20 }
  0xe4   : > { %813 = vmatprep.subr.mxu0 %v723_v12  ;;  %1291 = vmatprep.subr.mxu1 %v723_v12 }
  0xe5   : > { %814 = vmatpush1.msra.mxu0 %v722_v13  ;;  %1299 = vmatpush1.msra.mxu1 %v722_v13  ;;  %v436_v53 = vadd.f32 %v420_v41, %v354_v42  ;;  %v437_v3 = vadd.f32 %v421_v1, %v355_v49 }
  0xe6   : > { %815 = vmatprep.subr.mxu0 %v721_v14  ;;  %1292 = vmatprep.subr.mxu1 %v721_v14 }
  0xe7   : > { %v458_v16 = vpop.permute.xlu1 %457  ;;  %816 = vmatpush1.msra.mxu0 %v720_v43  ;;  %1300 = vmatpush1.msra.mxu1 %v720_v43 }
  0xe8   : > { %817 = vmatprep.subr.mxu0 %v719_v17  ;;  %1293 = vmatprep.subr.mxu1 %v719_v17  ;;  %v504_v56 = vmul.f32 %v1549_v60, %v458_v16  ;;  %v505_v11 = vmul.f32 %v1551_v61, %v458_v16 }
  0xe9   : > { %818 = vmatpush1.msra.mxu0 %v718_v19  ;;  %1301 = vmatpush1.msra.mxu1 %v718_v19 }
  0xea   : > { %v520_v27 = vadd.f32 %v504_v56, %v438_v21  ;;  %v521_v20 = vadd.f32 %v505_v11, %v439_v28 }
  0xec   : > { %v544_v31 = vpop.permute.xlu1 %543 }
  0xed   : > { %v588_v33 = vmul.f32 %v1553_v62, %v544_v31  ;;  %v589_v35 = vmul.f32 %v1555_v63, %v544_v31  ;;  %v730_v31 = vld [vmem:[%s1830_s3 + $0x10] sm:$0xff] }
  0xef   : > { %v604_v36 = vadd.f32 %v588_v33, %v522_v32  ;;  %v605_v10 = vadd.f32 %v589_v35, %v523_v45  ;;  %v738_v32 = vld [vmem:[%s1830_s3 + $0x50] sm:$0xff]  ;;  %v731_v45 = vld [vmem:[%s1830_s3 + $0x18] sm:$0xff]  ;;  %v732_v35 = vld [vmem:[%s1830_s3 + $0x20] sm:$0xff] }
  0xf0   : > { %v739_v33 = vld [vmem:[%s1830_s3 + $0x58] sm:$0xff] }
  0xf1   : > { %v668_v38 = vadd.f32 %v637_v37, %v604_v36  ;;  %v669_v46 = vadd.f32 %v637_v37, %v605_v10  ;;  %v454_v23 = vpop.permute.xlu1 %453  ;;  %v740_v36 = vld [vmem:[%s1830_s3 + $0x60] sm:$0xff]  ;;  %v733_v10 = vld [vmem:[%s1830_s3 + $0x28] sm:$0xff] }
  0xf2   : > { %v502_v55 = vmul.f32 %v1549_v60, %v454_v23  ;;  %v503_v2 = vmul.f32 %v1551_v61, %v454_v23  ;;  %v627_v61 = vpop.permute.xlu0 %626  ;;  %v741_v37 = vld [vmem:[%s1830_s3 + $0x68] sm:$0xff]  ;;  %v735_v23 = vld [vmem:[%s1830_s3 + $0x38] sm:$0xff] }
  0xf3   : > { %vm685_vm10 = vcmp.gt.f32.partialorder %v669_v46, 0.0  ;;  %v701_v39 = vmul.f32 0.2, %v669_v46  ;;  %vm684_vm11 = vcmp.gt.f32.partialorder %v668_v38, 0.0  ;;  %v700_v40 = vmul.f32 0.2, %v668_v38 }
  0xf4   : > { %v518_v48 = vadd.f32 %v502_v55, %v436_v53  ;;  %v519_v54 = vadd.f32 %v503_v2, %v437_v3 }
  0xf5   : > { %v717_v50 = vsel %vm685_vm10, %v669_v46, %v701_v39  ;;  %v716_v51 = vsel %vm684_vm11, %v668_v38, %v700_v40  ;;  %v734_v38 = vld [vmem:[%s1830_s3 + $0x30] sm:$0xff]  ;;  %v743_v39 = vld [vmem:[%s1830_s3 + $0x78] sm:$0xff] }
  0xf6   : > { %v540_v0 = vpop.permute.xlu1 %539  ;;  %819 = vmatprep.subr.mxu0 %v717_v50  ;;  %1294 = vmatprep.subr.mxu1 %v717_v50  ;;  %v742_v46 = vld [vmem:[%s1830_s3 + $0x70] sm:$0xff] }
  0xf7   : > { %820 = vmatpush1.msra.mxu0 %v716_v51  ;;  %1302 = vmatpush1.msra.mxu1 %v716_v51  ;;  %v586_v4 = vmul.f32 %v1553_v62, %v540_v0  ;;  %v587_v24 = vmul.f32 %v1555_v63, %v540_v0 }
  0xf9   : > { %v602_v12 = vadd.f32 %v586_v4, %v520_v27  ;;  %v603_v13 = vadd.f32 %v587_v24, %v521_v20 }
  0xfa   : > { %v536_v5 = vpop.permute.xlu1 %535 }
  0xfb   : > { %v584_v6 = vmul.f32 %v1553_v62, %v536_v5  ;;  %v585_v7 = vmul.f32 %v1555_v63, %v536_v5 }
  0xfd   : > { %v600_v60 = vadd.f32 %v584_v6, %v518_v48  ;;  %v601_v8 = vadd.f32 %v585_v7, %v519_v54 }
  0xff   : > { %v664_v34 = vadd.f32 %v627_v61, %v600_v60  ;;  %v665_v44 = vadd.f32 %v627_v61, %v601_v8  ;;  %v632_v14 = vpop.permute.xlu1 %631 }
 0x100   : > { %v666_v43 = vadd.f32 %v632_v14, %v602_v12  ;;  %v667_v9 = vadd.f32 %v632_v14, %v603_v13 }
 0x101   : > { %v697_v15 = vmul.f32 0.2, %v665_v44  ;;  %vm681_vm14 = vcmp.gt.f32.partialorder %v665_v44, 0.0  ;;  %v696_v62 = vmul.f32 0.2, %v664_v34  ;;  %vm680_vm15 = vcmp.gt.f32.partialorder %v664_v34, 0.0 }
 0x102   : > { %vm683_vm12 = vcmp.gt.f32.partialorder %v667_v9, 0.0  ;;  %v699_v16 = vmul.f32 0.2, %v667_v9  ;;  %vm682_vm13 = vcmp.gt.f32.partialorder %v666_v43, 0.0  ;;  %v698_v17 = vmul.f32 0.2, %v666_v43 }
 0x103   : > { %v713_v19 = vsel %vm681_vm14, %v665_v44, %v697_v15  ;;  %v712_v59 = vsel %vm680_vm15, %v664_v34, %v696_v62 }
 0x104   : > { %v715_v63 = vsel %vm683_vm12, %v667_v9, %v699_v16  ;;  %v714_v18 = vsel %vm682_vm13, %v666_v43, %v698_v17 }
 0x105   : > { %821 = vmatprep.subr.mxu0 %v715_v63  ;;  %1295 = vmatprep.subr.mxu1 %v715_v63 }
 0x106   : > { %822 = vmatpush1.msra.mxu0 %v714_v18  ;;  %1303 = vmatpush1.msra.mxu1 %v714_v18 }
 0x107   : > { %823 = vmatprep.subr.mxu0 %v713_v19  ;;  %1296 = vmatprep.subr.mxu1 %v713_v19 }
 0x108   : > { %824 = vmatpush1.msra.mxu0 %v712_v59  ;;  %1304 = vmatpush1.msra.mxu1 %v712_v59 }
 0x109   : > { %1268 = vmatmul.mubr.msk.f32.vlgmr.msra.gmra.mxu0 %vm744_vm0, %v728_v26  ;;  %1276 = vmatmul.mubr.msk.f32.vlgmr.msra.gmra.mxu1 %vm744_vm0, %v736_v25 }
 0x10a   : > { %863 = vmatprep.mubr.f32.mxu0 %v1389_v22  ;;  %911 = vmatprep.mubr.f32.mxu1 %v1389_v22 }
 0x10d   : > { %1269 = vmatmul.mubr.msk.f32.gmra.mxu0 %vm744_vm0, %v729_v47  ;;  %1277 = vmatmul.mubr.msk.f32.gmra.mxu1 %vm744_vm0, %v737_v30 }
 0x10e   : > { %869 = vmatprep.mubr.f32.mxu0 %v1389_v22  ;;  %917 = vmatprep.mubr.f32.mxu1 %v1389_v22 }
 0x111   : > { %1270 = vmatmul.mubr.msk.f32.gmra.mxu0 %vm744_vm0, %v730_v31  ;;  %1278 = vmatmul.mubr.msk.f32.gmra.mxu1 %vm744_vm0, %v738_v32 }
 0x112   : > { %875 = vmatprep.mubr.f32.mxu0 %v1389_v22  ;;  %923 = vmatprep.mubr.f32.mxu1 %v1389_v22 }
 0x115   : > { %1271 = vmatmul.mubr.msk.f32.gmra.mxu0 %vm744_vm0, %v731_v45  ;;  %1279 = vmatmul.mubr.msk.f32.gmra.mxu1 %vm744_vm0, %v739_v33 }
 0x116   : > { %881 = vmatprep.mubr.f32.mxu0 %v1389_v22  ;;  %929 = vmatprep.mubr.f32.mxu1 %v1389_v22 }
 0x119   : > { %1272 = vmatmul.mubr.msk.f32.gmra.mxu0 %vm744_vm0, %v732_v35  ;;  %1280 = vmatmul.mubr.msk.f32.gmra.mxu1 %vm744_vm0, %v740_v36 }
 0x11a   : > { %887 = vmatprep.mubr.f32.mxu0 %v1389_v22  ;;  %935 = vmatprep.mubr.f32.mxu1 %v1389_v22 }
 0x11d   : > { %1273 = vmatmul.mubr.msk.f32.gmra.mxu0 %vm744_vm0, %v733_v10  ;;  %1281 = vmatmul.mubr.msk.f32.gmra.mxu1 %vm744_vm0, %v741_v37 }
 0x11e   : > { %893 = vmatprep.mubr.f32.mxu0 %v1389_v22  ;;  %941 = vmatprep.mubr.f32.mxu1 %v1389_v22 }
 0x121   : > { %1274 = vmatmul.mubr.msk.f32.gmra.mxu0 %vm744_vm0, %v734_v38  ;;  %1282 = vmatmul.mubr.msk.f32.gmra.mxu1 %vm744_vm0, %v742_v46 }
 0x122   : > { %899 = vmatprep.mubr.f32.mxu0 %v1389_v22  ;;  %947 = vmatprep.mubr.f32.mxu1 %v1389_v22 }
 0x125   : > { %1275 = vmatmul.mubr.msk.f32.gmra.mxu0 %vm744_vm0, %v735_v23  ;;  %1283 = vmatmul.mubr.msk.f32.gmra.mxu1 %vm744_vm0, %v743_v39 }
 0x1c9   : > { %v859_v40 = vpop.f32.mrf.mxu0  ;;  %v907_v41 = vpop.f32.mrf.mxu1 }
 0x1ca   : > { %v1002_v58 = vmul.f32 %v859_v40, %v859_v40  ;;  %v1018_v21 = vmul.f32 %v907_v41, %v907_v41 }
 0x1cb   : > { %v861_v29 = vpop.f32.mrf.mxu0  ;;  %v909_v42 = vpop.f32.mrf.mxu1 }
 0x1cc   : > { %v1003_v49 = vmul.f32 %v861_v29, %v861_v29  ;;  %v978_v50 = vadd.f32 %v909_v42, %v907_v41  ;;  %v954_v51 = vadd.f32 %v861_v29, %v859_v40  ;;  %v1019_v22 = vmul.f32 %v909_v42, %v909_v42 }
 0x1cd   : > { %v865_v52 = vpop.f32.mrf.mxu0  ;;  %v913_v57 = vpop.f32.mrf.mxu1 }
 0x1ce   : > { %979 = vadd.xlane.f32.xlu0 %v978_v50  ;;  %955 = vadd.xlane.f32.xlu1 %v954_v51  ;;  %v1004_v55 = vmul.f32 %v865_v52, %v865_v52  ;;  %v1034_v56 = vadd.f32 %v1003_v49, %v1002_v58  ;;  %v1058_v24 = vadd.f32 %v1019_v22, %v1018_v21 }
 0x1cf   : > { %v867_v0 = vpop.f32.mrf.mxu0  ;;  %v915_v1 = vpop.f32.mrf.mxu1  ;;  %v1020_v6 = vmul.f32 %v913_v57, %v913_v57 }
 0x1d0   : > { %v1005_v2 = vmul.f32 %v867_v0, %v867_v0  ;;  %v981_v11 = vadd.f32 %v915_v1, %v913_v57  ;;  %v1021_v4 = vmul.f32 %v915_v1, %v915_v1  ;;  %v957_v27 = vadd.f32 %v867_v0, %v865_v52 }
 0x1d1   : > { %v871_v53 = vpop.f32.mrf.mxu0  ;;  %v919_v3 = vpop.f32.mrf.mxu1 }
 0x1d2   : > { %1035 = vadd.xlane.f32.xlu0 %v1034_v56  ;;  %982 = vadd.xlane.f32.xlu1 %v981_v11  ;;  %v1037_v5 = vadd.f32 %v1005_v2, %v1004_v55  ;;  %v1061_v7 = vadd.f32 %v1021_v4, %v1020_v6  ;;  %v1006_v34 = vmul.f32 %v871_v53, %v871_v53 }
 0x1d3   : > { %v873_v28 = vpop.f32.mrf.mxu0  ;;  %v921_v54 = vpop.f32.mrf.mxu1  ;;  %v1022_v62 = vmul.f32 %v919_v3, %v919_v3 }
 0x1d4   : > { %v960_v8 = vadd.f32 %v873_v28, %v871_v53  ;;  %v1007_v44 = vmul.f32 %v873_v28, %v873_v28  ;;  %v984_v9 = vadd.f32 %v921_v54, %v919_v3  ;;  %v1023_v63 = vmul.f32 %v921_v54, %v921_v54 }
 0x1d5   : > { %v877_v48 = vpop.f32.mrf.mxu0  ;;  %v925_v60 = vpop.f32.mrf.mxu1 }
 0x1d6   : > { %1059 = vadd.xlane.f32.xlu0 %v1058_v24  ;;  %1038 = vadd.xlane.f32.xlu1 %v1037_v5  ;;  %v1008_v14 = vmul.f32 %v877_v48, %v877_v48  ;;  %v1024_v18 = vmul.f32 %v925_v60, %v925_v60  ;;  %v1040_v26 = vadd.f32 %v1007_v44, %v1006_v34 }
 0x1d7   : > { %v879_v20 = vpop.f32.mrf.mxu0  ;;  %v927_v12 = vpop.f32.mrf.mxu1  ;;  %v1064_v30 = vadd.f32 %v1023_v63, %v1022_v62 }
 0x1d8   : > { %v963_v61 = vadd.f32 %v879_v20, %v877_v48  ;;  %v1009_v43 = vmul.f32 %v879_v20, %v879_v20  ;;  %v987_v15 = vadd.f32 %v927_v12, %v925_v60  ;;  %v1025_v19 = vmul.f32 %v927_v12, %v927_v12 }
 0x1d9   : > { %v883_v13 = vpop.f32.mrf.mxu0  ;;  %v931_v17 = vpop.f32.mrf.mxu1 }
 0x1da   : > { %1062 = vadd.xlane.f32.xlu1 %v1061_v7  ;;  %958 = vadd.xlane.f32.xlu0 %v957_v27  ;;  %v1043_v25 = vadd.f32 %v1009_v43, %v1008_v14  ;;  %v1067_v31 = vadd.f32 %v1025_v19, %v1024_v18  ;;  %v1010_v37 = vmul.f32 %v883_v13, %v883_v13 }
 0x1db   : > { %v885_v16 = vpop.f32.mrf.mxu0  ;;  %v933_v47 = vpop.f32.mrf.mxu1  ;;  %v1026_v42 = vmul.f32 %v931_v17, %v931_v17 }
 0x1dc   : > { %v966_v33 = vadd.f32 %v885_v16, %v883_v13  ;;  %v1011_v38 = vmul.f32 %v885_v16, %v885_v16  ;;  %v990_v39 = vadd.f32 %v933_v47, %v931_v17  ;;  %v1027_v49 = vmul.f32 %v933_v47, %v933_v47 }
 0x1dd   : > { %v889_v59 = vpop.f32.mrf.mxu0  ;;  %v937_v45 = vpop.f32.mrf.mxu1 }
 0x1de   : > { %961 = vadd.xlane.f32.xlu0 %v960_v8  ;;  %964 = vadd.xlane.f32.xlu1 %v963_v61  ;;  %v1012_v46 = vmul.f32 %v889_v59, %v889_v59  ;;  %v1028_v50 = vmul.f32 %v937_v45, %v937_v45  ;;  %v1046_v52 = vadd.f32 %v1011_v38, %v1010_v37 }
 0x1df   : > { %v891_v32 = vpop.f32.mrf.mxu0  ;;  %v939_v36 = vpop.f32.mrf.mxu1  ;;  %v1070_v0 = vadd.f32 %v1027_v49, %v1026_v42 }
 0x1e0   : > { %v969_v35 = vadd.f32 %v891_v32, %v889_v59  ;;  %v1013_v23 = vmul.f32 %v891_v32, %v891_v32  ;;  %v993_v40 = vadd.f32 %v939_v36, %v937_v45  ;;  %v1029_v51 = vmul.f32 %v939_v36, %v939_v36 }
 0x1e1   : > { %v895_v10 = vpop.f32.mrf.mxu0  ;;  %v943_v29 = vpop.f32.mrf.mxu1 }
 0x1e2   : > { %985 = vadd.xlane.f32.xlu0 %v984_v9  ;;  %988 = vadd.xlane.f32.xlu1 %v987_v15  ;;  %v1049_v57 = vadd.f32 %v1013_v23, %v1012_v46  ;;  %v1073_v1 = vadd.f32 %v1029_v51, %v1028_v50  ;;  %v1014_v3 = vmul.f32 %v895_v10, %v895_v10 }
 0x1e3   : > { %v897_v41 = vpop.f32.mrf.mxu0  ;;  %v945_v22 = vpop.f32.mrf.mxu1  ;;  %v1030_v48 = vmul.f32 %v943_v29, %v943_v29 }
 0x1e4   : > { %v972_v11 = vadd.f32 %v897_v41, %v895_v10  ;;  %v1015_v21 = vmul.f32 %v897_v41, %v897_v41  ;;  %v996_v5 = vadd.f32 %v945_v22, %v943_v29  ;;  %v1031_v54 = vmul.f32 %v945_v22, %v945_v22 }
 0x1e5   : > { %v901_v58 = vpop.f32.mrf.mxu0  ;;  %v949_v2 = vpop.f32.mrf.mxu1 }
 0x1e6   : > { %1041 = vadd.xlane.f32.xlu0 %v1040_v26  ;;  %1044 = vadd.xlane.f32.xlu1 %v1043_v25  ;;  %v1016_v28 = vmul.f32 %v901_v58, %v901_v58  ;;  %v1032_v6 = vmul.f32 %v949_v2, %v949_v2  ;;  %v1052_v27 = vadd.f32 %v1015_v21, %v1014_v3 }
 0x1e7   : > { %v903_v55 = vpop.f32.mrf.mxu0  ;;  %v951_v53 = vpop.f32.mrf.mxu1  ;;  %v1076_v60 = vadd.f32 %v1031_v54, %v1030_v48 }
 0x1e8   : > { %v975_v56 = vadd.f32 %v903_v55, %v901_v58  ;;  %v1017_v4 = vmul.f32 %v903_v55, %v903_v55  ;;  %v999_v24 = vadd.f32 %v951_v53, %v949_v2  ;;  %v1033_v7 = vmul.f32 %v951_v53, %v951_v53 }
 0x1ea   : > { %1065 = vadd.xlane.f32.xlu0 %v1064_v30  ;;  %1068 = vadd.xlane.f32.xlu1 %v1067_v31  ;;  %v1055_v20 = vadd.f32 %v1017_v4, %v1016_v28  ;;  %v1079_v8 = vadd.f32 %v1033_v7, %v1032_v6 }
 0x1ee   : > { %967 = vadd.xlane.f32.xlu0 %v966_v33  ;;  %970 = vadd.xlane.f32.xlu1 %v969_v35 }
 0x1f2   : > { %991 = vadd.xlane.f32.xlu0 %v990_v39  ;;  %994 = vadd.xlane.f32.xlu1 %v993_v40 }
 0x1f6   : > { %1047 = vadd.xlane.f32.xlu0 %v1046_v52  ;;  %1050 = vadd.xlane.f32.xlu1 %v1049_v57 }
 0x1fa   : > { %1071 = vadd.xlane.f32.xlu0 %v1070_v0  ;;  %1074 = vadd.xlane.f32.xlu1 %v1073_v1 }
 0x1fe   : > { %973 = vadd.xlane.f32.xlu0 %v972_v11  ;;  %976 = vadd.xlane.f32.xlu1 %v975_v56 }
 0x202   : > { %997 = vadd.xlane.f32.xlu0 %v996_v5  ;;  %1000 = vadd.xlane.f32.xlu1 %v999_v24 }
 0x206   : > { %1053 = vadd.xlane.f32.xlu0 %v1052_v27  ;;  %1056 = vadd.xlane.f32.xlu1 %v1055_v20 }
 0x20a   : > { %1077 = vadd.xlane.f32.xlu0 %v1076_v60  ;;  %1080 = vadd.xlane.f32.xlu1 %v1079_v8 }
 0x257   : > { %v980_v61 = vpop.xlane.xlu0 %979  ;;  %v956_v12 = vpop.xlane.xlu1 %955 }
 0x258   : > { %1091 = vst.msk [vmem:[%s1747_s30 + $0x40] sm:$0xff] %vm1082_vm1, %v980_v61  ;;  %1083 = vst.msk [vmem:[%s1747_s30] sm:$0xff] %vm1082_vm1, %v956_v12 }
 0x25b   : > { %v1036_v13 = vpop.xlane.xlu0 %1035  ;;  %v983_v34 = vpop.xlane.xlu1 %982 }
 0x25c   : > { %1099 = vst.msk [vmem:[%s1756_s18] sm:$0xff] %vm1082_vm1, %v1036_v13  ;;  %1092 = vst.msk [vmem:[%s1747_s30 + $0x48] sm:$0xff] %vm1082_vm1, %v983_v34 }
 0x25f   : > { %v1060_v44 = vpop.xlane.xlu0 %1059  ;;  %v1039_v14 = vpop.xlane.xlu1 %1038 }
 0x260   : > { %1107 = vst.msk [vmem:[%s1756_s18 + $0x40] sm:$0xff] %vm1082_vm1, %v1060_v44  ;;  %1100 = vst.msk [vmem:[%s1756_s18 + $0x8] sm:$0xff] %vm1082_vm1, %v1039_v14 }
 0x263   : > { %v1063_v43 = vpop.xlane.xlu1 %1062  ;;  %v959_v9 = vpop.xlane.xlu0 %958 }
 0x264   : > { %1108 = vst.msk [vmem:[%s1756_s18 + $0x48] sm:$0xff] %vm1082_vm1, %v1063_v43  ;;  %1084 = vst.msk [vmem:[%s1747_s30 + $0x8] sm:$0xff] %vm1082_vm1, %v959_v9 }
 0x267   : > { %v962_v15 = vpop.xlane.xlu0 %961  ;;  %v965_v16 = vpop.xlane.xlu1 %964 }
 0x268   : > { %1085 = vst.msk [vmem:[%s1747_s30 + $0x10] sm:$0xff] %vm1082_vm1, %v962_v15  ;;  %1086 = vst.msk [vmem:[%s1747_s30 + $0x18] sm:$0xff] %vm1082_vm1, %v965_v16 }
 0x26b   : > { %v986_v17 = vpop.xlane.xlu0 %985  ;;  %v989_v62 = vpop.xlane.xlu1 %988 }
 0x26c   : > { %1093 = vst.msk [vmem:[%s1747_s30 + $0x50] sm:$0xff] %vm1082_vm1, %v986_v17  ;;  %1094 = vst.msk [vmem:[%s1747_s30 + $0x58] sm:$0xff] %vm1082_vm1, %v989_v62 }
 0x26f   : > { %v1042_v63 = vpop.xlane.xlu0 %1041  ;;  %v1045_v18 = vpop.xlane.xlu1 %1044 }
 0x270   : > { %1101 = vst.msk [vmem:[%s1756_s18 + $0x10] sm:$0xff] %vm1082_vm1, %v1042_v63  ;;  %1102 = vst.msk [vmem:[%s1756_s18 + $0x18] sm:$0xff] %vm1082_vm1, %v1045_v18 }
 0x273   : > { %v1066_v19 = vpop.xlane.xlu0 %1065  ;;  %v1069_v26 = vpop.xlane.xlu1 %1068 }
 0x274   : > { %1109 = vst.msk [vmem:[%s1756_s18 + $0x50] sm:$0xff] %vm1082_vm1, %v1066_v19  ;;  %1110 = vst.msk [vmem:[%s1756_s18 + $0x58] sm:$0xff] %vm1082_vm1, %v1069_v26 }
 0x277   : > { %v968_v25 = vpop.xlane.xlu0 %967  ;;  %v971_v59 = vpop.xlane.xlu1 %970 }
 0x278   : > { %1087 = vst.msk [vmem:[%s1747_s30 + $0x20] sm:$0xff] %vm1082_vm1, %v968_v25  ;;  %1088 = vst.msk [vmem:[%s1747_s30 + $0x28] sm:$0xff] %vm1082_vm1, %v971_v59 }
 0x27b   : > { %v992_v47 = vpop.xlane.xlu0 %991  ;;  %v995_v30 = vpop.xlane.xlu1 %994 }
 0x27c   : > { %1095 = vst.msk [vmem:[%s1747_s30 + $0x60] sm:$0xff] %vm1082_vm1, %v992_v47  ;;  %1096 = vst.msk [vmem:[%s1747_s30 + $0x68] sm:$0xff] %vm1082_vm1, %v995_v30 }
 0x27f   : > { %v1048_v31 = vpop.xlane.xlu0 %1047  ;;  %v1051_v32 = vpop.xlane.xlu1 %1050 }
 0x280   : > { %1103 = vst.msk [vmem:[%s1756_s18 + $0x20] sm:$0xff] %vm1082_vm1, %v1048_v31  ;;  %1104 = vst.msk [vmem:[%s1756_s18 + $0x28] sm:$0xff] %vm1082_vm1, %v1051_v32 }
 0x283   : > { %v1072_v45 = vpop.xlane.xlu0 %1071  ;;  %v1075_v33 = vpop.xlane.xlu1 %1074 }
 0x284   : > { %1111 = vst.msk [vmem:[%s1756_s18 + $0x60] sm:$0xff] %vm1082_vm1, %v1072_v45  ;;  %1112 = vst.msk [vmem:[%s1756_s18 + $0x68] sm:$0xff] %vm1082_vm1, %v1075_v33 }
 0x287   : > { %v974_v35 = vpop.xlane.xlu0 %973  ;;  %v977_v36 = vpop.xlane.xlu1 %976 }
 0x288   : > { %1089 = vst.msk [vmem:[%s1747_s30 + $0x30] sm:$0xff] %vm1082_vm1, %v974_v35  ;;  %1090 = vst.msk [vmem:[%s1747_s30 + $0x38] sm:$0xff] %vm1082_vm1, %v977_v36 }
 0x28b   : > { %v998_v10 = vpop.xlane.xlu0 %997  ;;  %v1001_v37 = vpop.xlane.xlu1 %1000 }
 0x28c   : > { %1097 = vst.msk [vmem:[%s1747_s30 + $0x70] sm:$0xff] %vm1082_vm1, %v998_v10  ;;  %1098 = vst.msk [vmem:[%s1747_s30 + $0x78] sm:$0xff] %vm1082_vm1, %v1001_v37 }
 0x28f   : > { %v1054_v38 = vpop.xlane.xlu0 %1053  ;;  %v1057_v46 = vpop.xlane.xlu1 %1056 }
 0x290   : > { %1105 = vst.msk [vmem:[%s1756_s18 + $0x30] sm:$0xff] %vm1082_vm1, %v1054_v38  ;;  %1106 = vst.msk [vmem:[%s1756_s18 + $0x38] sm:$0xff] %vm1082_vm1, %v1057_v46 }
 0x293   : > { %v1078_v23 = vpop.xlane.xlu0 %1077  ;;  %v1081_v39 = vpop.xlane.xlu1 %1080 }
 0x294   : > { %1113 = vst.msk [vmem:[%s1756_s18 + $0x70] sm:$0xff] %vm1082_vm1, %v1078_v23  ;;  %1114 = vst.msk [vmem:[%s1756_s18 + $0x78] sm:$0xff] %vm1082_vm1, %v1081_v39 }
 0x295 PF: > { %s16_s20 = sadd.s32 1, %s1383_s20   ;;  %s1833_s18 = smov %s1379_s19 }
 0x296   : > { %p13_p5 = scmp.ge.s32.totalorder %s16_s20, 4   ;;  %s1834_s19 = smov %s1836_s21 }
 0x298   :  { %15 = sbr.rel (!%p13_p5) target bundleno = 2 (0x2), region = 78 }

</bundles_post_ra>
